<compile_context>
chip_gen: v7x
topology: tpu7x:2x2x1
jax: 0.10.0
libtpu: 0.0.40
codegen_flags: <defaults>
</compile_context>

<pallas_src>
import functools

import jax
import jax.numpy as jnp
from jax.experimental import pallas as pl
from jax.experimental.pallas import tpu as pltpu


def _xent_block_kernel(pred_ref, tgt_ref, out_ref, *, ignore_index):
    """Per-block cross-entropy partial sum (ignore_index masked).

    pred_ref: (TM, V)     logits block in the model's native dtype
    tgt_ref : (TM, 1)     int32 targets (tile-padding rows carry ignore_index)
    out_ref : (1, 1, 128) f32 per-block partial (scalar broadcast across lanes)
    """
    logits = pred_ref[...].astype(jnp.float32)   # f32 compute inside (v5e has no bf16 VPU/EUP)
    tgt = tgt_ref[...]                           # (TM, 1) int32

    # numerically stable logsumexp over the vocab (lane) axis
    m = jnp.max(logits, axis=-1, keepdims=True)                                  # (TM, 1)
    lse = m + jnp.log(jnp.sum(jnp.exp(logits - m), axis=-1, keepdims=True))      # (TM, 1)

    # gather logit at the target index via lane-iota one-hot select
    col = jax.lax.broadcasted_iota(jnp.int32, logits.shape, 1)
    tgt_logit = jnp.sum(jnp.where(col == tgt, logits, 0.0), axis=-1, keepdims=True)

    # mask ignored rows; this also covers tile-padding rows (their target is
    # ignore_index) and any garbage logits read past the end of pred, since
    # jnp.where (unlike a multiply) does not propagate NaN/inf from masked rows.
    valid = tgt != ignore_index
    loss_rows = jnp.where(valid, lse - tgt_logit, 0.0)                           # (TM, 1)

    partial = jnp.sum(loss_rows)                                                 # block-local reduce
    out_ref[...] = jnp.full((1, 1, 128), partial, dtype=jnp.float32)


def _pick_row_tile(n_rows, vocab, itemsize, vmem_budget_bytes=24 * 1024 * 1024):
    """Largest row tile whose double-buffered pred block fits the VMEM budget."""
    rt = vmem_budget_bytes // (2 * vocab * itemsize)          # 2x for double buffering
    rt = max(32, min(512, (rt // 32) * 32))                   # 32 | rt: ok for f32/bf16/i8 packing
    rt = min(rt, max(32, ((n_rows + 31) // 32) * 32))         # don't over-tile tiny problems
    return int(rt)
    # TODO(synk): for very large vocabularies (2*32*V*itemsize > budget) add a vocab grid
    # axis with an online (flash-style) logsumexp instead of a full-V block.


def reconstruction_loss(pred, target, length=None, *, ignore_index, row_tile=None):
    """JAX/Pallas equivalent of Reconstruction_loss.forward.

    pred   : (B*Lmax, V) or (B, Lmax, V) logits, any float dtype
    target : (B, L) int32 token ids (L >= Lmax)
    length : (B,) int32 sequence lengths (accepted for API parity; Lmax is derived
             statically from pred/target shapes, avoiding the host sync of .item())
    returns: scalar float32 summed NLL loss
    """
    V = pred.shape[-1]
    pred_flat = pred.reshape(-1, V)                    # native dtype, no HBM upcast copy
    N = pred_flat.shape[0]
    B = target.shape[0]
    assert N % B == 0, "pred rows must be a multiple of the batch size"
    max_len = N // B                                   # == torch.max(length).item() for valid inputs
    tgt_flat = target[:, :max_len].reshape(-1).astype(jnp.int32)   # (N,)

    itemsize = jnp.dtype(pred_flat.dtype).itemsize
    if row_tile is None:
        row_tile = _pick_row_tile(N, V, itemsize)
    num_blocks = (N + row_tile - 1) // row_tile
    padded_rows = num_blocks * row_tile

    # Pad only the tiny target array; pred is read past-the-end in the last block
    # and those rows are masked inside the kernel via the ignore_index targets.
    n_pad = padded_rows - N
    if n_pad:
        tgt_flat = jnp.concatenate(
            [tgt_flat, jnp.full((n_pad,), ignore_index, jnp.int32)], axis=0)
    tgt_2d = tgt_flat.reshape(padded_rows, 1)

    kernel = functools.partial(_xent_block_kernel, ignore_index=ignore_index)

    partials = pl.pallas_call(
        kernel,
        out_shape=jax.ShapeDtypeStruct((num_blocks, 1, 128), jnp.float32),
        grid_spec=pltpu.PrefetchScalarGridSpec(
            num_scalar_prefetch=0,
            grid=(num_blocks,),
            in_specs=[
                pl.BlockSpec((row_tile, V), lambda i: (i, 0)),
                pl.BlockSpec((row_tile, 1), lambda i: (i, 0)),
            ],
            out_specs=pl.BlockSpec((1, 1, 128), lambda i: (i, 0, 0)),
        ),
        compiler_params=pltpu.CompilerParams(
            dimension_semantics=("parallel",),        # independent blocks -> megacore on v7x
            vmem_limit_bytes=48 * 1024 * 1024,        # above default scoped limit, < v7x physical
        ),
    )(pred_flat, tgt_2d)

    # each block broadcast its scalar partial across 128 lanes; take lane 0 and sum
    return jnp.sum(partials[:, 0, 0])


def _reference_loss(pred, target, ignore_index):
    """Pure-JAX reference for verification."""
    V = pred.shape[-1]
    logits = pred.reshape(-1, V).astype(jnp.float32)
    B = target.shape[0]
    max_len = logits.shape[0] // B
    tgt = target[:, :max_len].reshape(-1)
    lse = jax.nn.logsumexp(logits, axis=-1)
    tgt_logit = jnp.take_along_axis(
        logits, jnp.clip(tgt, 0, V - 1)[:, None], axis=-1)[:, 0]
    valid = tgt != ignore_index
    return jnp.sum(jnp.where(valid, lse - tgt_logit, 0.0))


if __name__ == "__main__":
    key = jax.random.PRNGKey(0)
    ignore_index = 0

    # ---- case 1: small shapes implied by the torch module -------------------
    B, L, V = 2, 8, 32
    length = jnp.array([8, 5], dtype=jnp.int32)
    max_len = 8
    k1, k2 = jax.random.split(key)
    pred = jax.random.normal(k1, (B * max_len, V), dtype=jnp.float32)
    target = jax.random.randint(k2, (B, L), 0, V, dtype=jnp.int32)
    pos = jnp.arange(L)[None, :]
    target = jnp.where(pos < length[:, None], target, ignore_index)

    loss = jax.block_until_ready(
        reconstruction_loss(pred, target, length, ignore_index=ignore_index))
    ref = _reference_loss(pred, target, ignore_index)
    assert jnp.allclose(loss, ref, rtol=1e-5, atol=1e-4), (loss, ref)

    # ---- case 2: multi-block grid, ragged row count, bf16 logits -------------
    B2, L2, V2 = 4, 40, 160
    k3, k4 = jax.random.split(k1)
    length2 = jnp.array([40, 33, 17, 40], dtype=jnp.int32)
    pred2 = jax.random.normal(k3, (B2 * L2, V2), dtype=jnp.bfloat16)
    target2 = jax.random.randint(k4, (B2, L2), 0, V2, dtype=jnp.int32)
    pos2 = jnp.arange(L2)[None, :]
    target2 = jnp.where(pos2 < length2[:, None], target2, ignore_index)

    loss2 = jax.block_until_ready(
        reconstruction_loss(pred2, target2, length2,
                            ignore_index=ignore_index, row_tile=64))
    ref2 = _reference_loss(pred2, target2, ignore_index)
    assert jnp.allclose(loss2, ref2, rtol=1e-4, atol=1e-2), (loss2, ref2)

    print("KERNEL_OK")
</pallas_src>

<mosaic_0001>
module attributes {stable_mosaic.version = 11 : i64} {
  func.func @_xent_block_kernel(%arg0: i32, %arg1: memref<32x32xf32, #tpu.memory_space<vmem>>, %arg2: memref<32x1xi32, #tpu.memory_space<vmem>>, %arg3: memref<1x1x128xf32, #tpu.memory_space<vmem>>) attributes {dimension_semantics = [#tpu.dimension_semantics<parallel>], iteration_bounds = array<i64: 1>, scalar_prefetch = 0 : i64, scratch_operands = 0 : i64, tpu.core_type = #tpu.core_type<tc>, window_params = [{transform_indices = @transform_0, window_bounds = array<i64: 32, 32>}, {transform_indices = @transform_1, window_bounds = array<i64: 32, 1>}, {transform_indices = @transform_2, window_bounds = array<i64: 1, 1, 128>}]} {
    %c0 = arith.constant 0 : index
    %c0_0 = arith.constant 0 : index
    %0 = vector.load %arg1[%c0, %c0_0] : memref<32x32xf32, #tpu.memory_space<vmem>>, vector<32x32xf32>
    %c0_1 = arith.constant 0 : index
    %c0_2 = arith.constant 0 : index
    %1 = vector.load %arg2[%c0_1, %c0_2] : memref<32x1xi32, #tpu.memory_space<vmem>>, vector<32x1xi32>
    %cst = arith.constant dense<0xFF800000> : vector<32xf32>
    %2 = vector.multi_reduction <maximumf>, %0, %cst [1] : vector<32x32xf32> to vector<32xf32>
    %3 = vector.shape_cast %2 : vector<32xf32> to vector<32x1xf32>
    %4 = vector.broadcast %3 : vector<32x1xf32> to vector<32x32xf32>
    %5 = arith.subf %0, %4 : vector<32x32xf32>
    %6 = math.exp %5 : vector<32x32xf32>
    %cst_3 = arith.constant dense<0.000000e+00> : vector<32xf32>
    %7 = vector.multi_reduction <add>, %6, %cst_3 [1] : vector<32x32xf32> to vector<32xf32>
    %8 = vector.shape_cast %7 : vector<32xf32> to vector<32x1xf32>
    %9 = math.log %8 : vector<32x1xf32>
    %10 = arith.addf %3, %9 : vector<32x1xf32>
    %11 = tpu.iota {dimensions = array<i32: 1>} : vector<32x32xi32>
    %12 = vector.broadcast %1 : vector<32x1xi32> to vector<32x32xi32>
    %13 = arith.cmpi eq, %11, %12 : vector<32x32xi32>
    %cst_4 = arith.constant 0.000000e+00 : f32
    %14 = vector.broadcast %cst_4 : f32 to vector<32x32xf32>
    %15 = arith.select %13, %0, %14 : vector<32x32xi1>, vector<32x32xf32>
    %cst_5 = arith.constant dense<0.000000e+00> : vector<32xf32>
    %16 = vector.multi_reduction <add>, %15, %cst_5 [1] : vector<32x32xf32> to vector<32xf32>
    %17 = vector.shape_cast %16 : vector<32xf32> to vector<32x1xf32>
    %c0_i32 = arith.constant 0 : i32
    %18 = vector.broadcast %c0_i32 : i32 to vector<32x1xi32>
    %19 = arith.cmpi ne, %1, %18 : vector<32x1xi32>
    %20 = arith.subf %10, %17 : vector<32x1xf32>
    %cst_6 = arith.constant 0.000000e+00 : f32
    %21 = vector.broadcast %cst_6 : f32 to vector<32x1xf32>
    %22 = arith.select %19, %20, %21 : vector<32x1xi1>, vector<32x1xf32>
    %23 = vector.shape_cast %22 : vector<32x1xf32> to vector<1x32x1xf32>
    %cst_7 = arith.constant dense<0.000000e+00> : vector<1xf32>
    %24 = vector.multi_reduction <add>, %23, %cst_7 [1, 2] : vector<1x32x1xf32> to vector<1xf32>
    %25 = vector.shape_cast %24 : vector<1xf32> to vector<1x1x1xf32>
    %26 = vector.extract %25[0, 0, 0] : f32 from vector<1x1x1xf32>
    %27 = vector.broadcast %26 : f32 to vector<1x1x128xf32>
    %c0_8 = arith.constant 0 : index
    %c0_9 = arith.constant 0 : index
    %c0_10 = arith.constant 0 : index
    %28 = vector.load %arg3[%c0_8, %c0_9, %c0_10] : memref<1x1x128xf32, #tpu.memory_space<vmem>>, vector<1x1x128xf32>
    tpu.vector_store %arg3[%c0_8, %c0_9, %c0_10], %27 {strides = array<i32>} : memref<1x1x128xf32, #tpu.memory_space<vmem>>, vector<1x1x128xf32>,
    return
  }
  func.func @transform_0(%arg0: i32) -> (i32, i32) {
    %c0_i32 = arith.constant 0 : i32
    %c0_i32_0 = arith.constant 0 : i32
    return %arg0, %c0_i32 : i32, i32
  }
  func.func @transform_1(%arg0: i32) -> (i32, i32) {
    %c0_i32 = arith.constant 0 : i32
    %c0_i32_0 = arith.constant 0 : i32
    return %arg0, %c0_i32 : i32, i32
  }
  func.func @transform_2(%arg0: i32) -> (i32, i32, i32) {
    %c0_i32 = arith.constant 0 : i32
    %c0_i32_0 = arith.constant 0 : i32
    %c0_i32_1 = arith.constant 0 : i32
    return %arg0, %c0_i32, %c0_i32_0 : i32, i32, i32
  }
}

</mosaic_0001>

<bundles_post_ra>
// kernel: tpu_custom_call.1
= control target key start
LH: loop header
LB: loop body
LE: loop exit
PB: predicated region body
PF: predicated region fallthrough
CT: control target
= control target key end

     0   :  { %vm20_vm0 = vcmask 261120   ;;  %v194_v6 = vmov 0   ;;  %s297_s0 = inlined_call_operand.vmem [shape: f32[16,32], index: 0, kind: input, shape index: {}]   ;;  %s298_s1 = inlined_call_operand.vmem [shape: s32[32,1], index: 1, kind: input, shape index: {}]   ;;  %s299_s2 = inlined_call_operand.hbm [shape: f32[1,1,128], index: 2, kind: output, shape index: {}]  }
   0x1   :  { %v12_v0 = vld [vmem:[%s297_s0] sm:$0xff]  ;;  %v14_v1 = vld [vmem:[%s297_s0 + $0x10] sm:$0xff]  ;;  %v220_v2 = vld [vmem:[%s297_s0 + $0x8] sm:$0xff]  ;;  %153 = vset.pattern.permute.xlu1 %v194_v6  ;;  %152 = vset.pattern.permute.xlu0 %v194_v6 }
   0x2   :  { %v21_v3 = vsel %vm20_vm0, %v12_v0, -inf  ;;  %v27_v4 = vsel %vm20_vm0, %v14_v1, -inf  ;;  %v227_v5 = vld [vmem:[%s297_s0 + $0x18] sm:$0xff]  ;;  %v24_v7 = vsel %vm20_vm0, %v220_v2, -inf }
   0x3   :  { %22 = vmax.xlane.f32.xlu0 %v21_v3  ;;  %28 = vmax.xlane.f32.xlu1 %v27_v4  ;;  %v30_v8 = vsel %vm20_vm0, %v227_v5, -inf }
   0x4   :  { %7 = vsyncpa [#allocation3], 0  ;;  %v236_v9 = vld [vmem:[%s298_s1 + $0x8] sm:$0xff]  ;;  %v242_v10 = vld [vmem:[%s298_s1 + $0x10] sm:$0xff]  ;;  %v69_v26 = vlaneseq  ;;  %vm115_vm8 = vcmask 7168  }
   0x5   :  { %v247_v11 = vld [vmem:[%s298_s1] sm:$0xff]  ;;  %v254_v12 = vld [vmem:[%s298_s1 + $0x18] sm:$0xff]  ;;  %vm104_vm6 = vcmp.ne.s32.totalorder %v236_v9, 0  ;;  %vm105_vm7 = vcmp.ne.s32.totalorder %v242_v10, 0  ;;  %s195_s1 = smov [#allocation2]  }
   0x6   :  { %v70_v27 = vand.u32 127, %v69_v26  ;;  %vm103_vm5 = vcmp.ne.s32.totalorder %v247_v11, 0  ;;  %vm106_vm9 = vcmp.ne.s32.totalorder %v254_v12, 0  ;;  %s140_s24 = sshll.u32 %s195_s1, 4  ;;  %s141_s24 = int_to_ptr.vmem [resolvable:$true] %s140_s24 }
   0x7   :  { %25 = vmax.xlane.f32.xlu0 %v24_v7  ;;  %31 = vmax.xlane.f32.xlu1 %v30_v8  ;;  %s170_s26 = scalar_lea.vmem %s141_s24, 16  ;;  %s174_s27 = scalar_lea.vmem %s141_s24, 32 }
   0x8   :  { %p171_p0 = scmp.ne.s32.totalorder %s141_s24, %s170_s26  ;;  %p175_p1 = scmp.lt.s32.totalorder %s141_s24, %s141_s24 }
   0x9   :  { %p176_p2 = scmp.lt.s32.totalorder %s174_s27, %s170_s26 }
   0xb   :  { %p177_p3 = por %p176_p2, %p175_p1 }
   0xd   :  { %p178_p4 = pnand %p177_p3, %p171_p0 }
  0x18   :  { %75 = vperm.xlu1 %153, %v236_v9  }
  0x1c   :  { %78 = vperm.xlu1 %153, %v242_v10  }
  0x1d   :  { %72 = vperm.xlu0 %152, %v247_v11  }
  0x20   :  { %81 = vperm.xlu1 %153, %v254_v12  }
  0x90   :  { %v23_v13 = vpop.xlane.xlu0 %22  ;;  %v257_v14 = vpop.xlane.xlu1 %28 }
  0x91   :  { %v33_v15 = vsub.f32 %v12_v0, %v23_v13  ;;  %v35_v16 = vsub.f32 %v14_v1, %v257_v14 }
  0x93   :  { %v37_v17 = vmul.f32 1.442695, %v33_v15  ;;  %v41_v18 = vmul.f32 1.442695, %v35_v16 }
  0x94   :  { %v260_v19 = vpop.xlane.xlu0 %25  ;;  %v262_v20 = vpop.xlane.xlu1 %31 }
  0x95   :  { %154 = vpow2.f32 %v37_v17  ;;  %v34_v21 = vsub.f32 %v220_v2, %v260_v19  ;;  %v36_v22 = vsub.f32 %v227_v5, %v262_v20 }
  0x96   :  { %156 = vpow2.f32 %v41_v18 }
  0x97   :  { %v39_v23 = vmul.f32 1.442695, %v34_v21  ;;  %v43_v24 = vmul.f32 1.442695, %v36_v22 }
  0x98   :  { %v76_v25 = vpop.permute.xlu1 %75 }
  0x99   :  { %158 = vpow2.f32 %v39_v23  ;;  %vm84_vm3 = vcmp.eq.s32.totalorder %v70_v27, %v76_v25 }
  0x9a   :  { %160 = vpow2.f32 %v43_v24  ;;  %v88_v43 = vsel %vm84_vm3, %v220_v2, 0.0 }
  0x9b   :  { %v94_v44 = vsel %vm20_vm0, %v88_v43, 0.0 }
  0x9c   :  { %v79_v29 = vpop.permute.xlu1 %78  ;;  %v73_v32 = vpop.permute.xlu0 %72 }
  0x9d   :  { %vm85_vm1 = vcmp.eq.s32.totalorder %v70_v27, %v79_v29  ;;  %vm83_vm2 = vcmp.eq.s32.totalorder %v70_v27, %v73_v32 }
  0x9e   :  { %v89_v35 = vsel %vm85_vm1, %v14_v1, 0.0  ;;  %v87_v40 = vsel %vm83_vm2, %v12_v0, 0.0 }
  0x9f   :  { %v155_v28 = vpop.eup %154  ;;  %v97_v39 = vsel %vm20_vm0, %v89_v35, 0.0  ;;  %v91_v41 = vsel %vm20_vm0, %v87_v40, 0.0 }
  0xa0   :  { %v157_v30 = vpop.eup %156  ;;  %v45_v31 = vsel %vm20_vm0, %v155_v28, 0.0  ;;  %v82_v42 = vpop.permute.xlu1 %81 }
  0xa1   :  { %46 = vadd.xlane.f32.xlu1 %v45_v31  ;;  %v51_v33 = vsel %vm20_vm0, %v157_v30, 0.0  ;;  %vm86_vm4 = vcmp.eq.s32.totalorder %v70_v27, %v82_v42 }
  0xa2   :  { %v90_v45 = vsel %vm86_vm4, %v227_v5, 0.0 }
  0xa3   :  { %v159_v34 = vpop.eup %158  ;;  %v100_v46 = vsel %vm20_vm0, %v90_v45, 0.0 }
  0xa4   :  { %v161_v36 = vpop.eup %160  ;;  %v48_v37 = vsel %vm20_vm0, %v159_v34, 0.0 }
  0xa5   :  { %52 = vadd.xlane.f32.xlu1 %v51_v33  ;;  %49 = vadd.xlane.f32.xlu0 %v48_v37  ;;  %v54_v38 = vsel %vm20_vm0, %v161_v36, 0.0 }
  0xa9   :  { %55 = vadd.xlane.f32.xlu1 %v54_v38  ;;  %98 = vadd.xlane.f32.xlu0 %v97_v39 }
  0xad   :  { %92 = vadd.xlane.f32.xlu1 %v91_v41 }
  0xb1   :  { %95 = vadd.xlane.f32.xlu1 %v94_v44 }
  0xb5   :  { %101 = vadd.xlane.f32.xlu1 %v100_v46 }
 0x12e   :  { %v47_v47 = vpop.xlane.xlu1 %46 }
 0x12f   :  { %162 = vlog2.f32 %v47_v47 }
 0x132   :  { %v53_v48 = vpop.xlane.xlu1 %52  ;;  %v50_v49 = vpop.xlane.xlu0 %49 }
 0x133   :  { %164 = vlog2.f32 %v53_v48 }
 0x134   :  { %166 = vlog2.f32 %v50_v49 }
 0x136   :  { %v56_v50 = vpop.xlane.xlu1 %55  ;;  %v99_v63 = vpop.xlane.xlu0 %98 }
 0x137   :  { %168 = vlog2.f32 %v56_v50 }
 0x139   :  { %v163_v51 = vpop.eup %162 }
 0x13a   :  { %v58_v52 = vmul.f32 0.6931472, %v163_v51  ;;  %v93_v53 = vpop.xlane.xlu1 %92 }
 0x13c   :  { %v65_v54 = vadd.f32 %v58_v52, %v23_v13 }
 0x13d   :  { %v165_v55 = vpop.eup %164 }
 0x13e   :  { %v167_v56 = vpop.eup %166  ;;  %v62_v57 = vmul.f32 0.6931472, %v165_v55  ;;  %v107_v59 = vsub.f32 %v65_v54, %v93_v53  ;;  %v96_v60 = vpop.xlane.xlu1 %95 }
 0x13f   :  { %v60_v58 = vmul.f32 0.6931472, %v167_v56 }
 0x140   :  { %v67_v61 = vadd.f32 %v62_v57, %v257_v14  ;;  %v111_v3 = vsel %vm103_vm5, %v107_v59, 0.0 }
 0x141   :  { %v169_v62 = vpop.eup %168  ;;  %v66_v0 = vadd.f32 %v60_v58, %v260_v19  ;;  %v116_v11 = vsel %vm115_vm8, %v111_v3, 0.0 }
 0x142   :  { %v64_v1 = vmul.f32 0.6931472, %v169_v62  ;;  %v109_v2 = vsub.f32 %v67_v61, %v99_v63  ;;  %v102_v8 = vpop.xlane.xlu1 %101 }
 0x143   :  { %v108_v4 = vsub.f32 %v66_v0, %v96_v60 }
 0x144   :  { %v68_v5 = vadd.f32 %v64_v1, %v262_v20  ;;  %v113_v6 = vsel %vm105_vm7, %v109_v2, 0.0 }
 0x145   :  { %v112_v7 = vsel %vm104_vm6, %v108_v4, 0.0  ;;  %v119_v16 = vsel %vm115_vm8, %v113_v6, 0.0 }
 0x146   :  { %v117_v13 = vsel %vm115_vm8, %v112_v7, 0.0  ;;  %v110_v14 = vsub.f32 %v68_v5, %v102_v8 }
 0x147   :  { %v118_v15 = vadd.f32 %v117_v13, %v116_v11 }
 0x148   :  { %v114_v9 = vsel %vm106_vm9, %v110_v14, 0.0 }
 0x149   :  { %v120_v17 = vadd.f32 %v119_v16, %v118_v15  ;;  %v121_v10 = vsel %vm115_vm8, %v114_v9, 0.0 }
 0x14b   :  { %v122_v18 = vadd.f32 %v121_v10, %v120_v17 }
 0x14d   :  { %123 = vadd.xlane.f32.xlu0 %v122_v18 }
 0x1da   :  { %v124_v19 = vpop.xlane.xlu0 %123 }
 0x1db   :  { %v125_v21 = vrot.slane %v124_v19, 4 }
 0x1dd   :  { %v126_v22 = vadd.f32 %v125_v21, %v124_v19 }
 0x1df   :  { %v127_v23 = vrot.slane %v126_v22, 2 }
 0x1e1   :  { %v128_v20 = vadd.f32 %v127_v23, %v126_v22 }
 0x1e3   :  { %v129_v24 = vrot.slane %v128_v20, 1 }
 0x1e5   :  { %v130_v12 = vadd.f32 %v129_v24, %v128_v20 }
 0x1e7   :  { %148 = vpush %v130_v12 }
 0x218   :  { %s149_s25 = spop %148 }
 0x219   :  { %v132_v25 = vstv %s149_s25 }
 0x21a   :  { %133 = vst [vmem:[#allocation2] sm:$0x1] %v132_v25 }
 0x21b   :  { %181 = shalt.err (!%p178_p4)
}
 0x21c   :  { %s182_s30 = scalar_lea.hbm %s299_s2, 16 }
 0x21d   :  { %p183_p5 = scmp.ne.s32.totalorder %s299_s2, %s182_s30  ;;  %p186_p6 = scmp.lt.u32.totalorder %s182_s30, %s299_s2 }
 0x21f   :  { %p188_p7 = pnand %p186_p6, %p183_p5 }
 0x221   :  { %191 = shalt.err (!%p188_p7)
}
 0x222   :  { %143 = dma.vmem_to_hbm [thread:$0]  %s141_s24, 16, %s299_s2, [#allocation3]  }
 0x223   :  { %192 = dma.done.wait [#allocation3], 16  }
 0x224   :  { %193 = vsyncadd [#allocation3], 4294967280 }
 0x225   :  { %147 = vsyncpa [#allocation3], 1 }

</bundles_post_ra>
